<compile_context>
chip_gen: v7x
topology: tpu7x:2x2x1
jax: 0.10.0
libtpu: 0.0.40
codegen_flags: <defaults>
</compile_context>

<pallas_src>
import functools

import numpy as np
import jax
import jax.numpy as jnp
from jax.experimental import pallas as pl
from jax.experimental.pallas import tpu as pltpu


def _round_up(x: int, m: int) -> int:
    return ((x + m - 1) // m) * m


def _default_act_dtype():
    """bf16 elementwise on chips with a bf16 VPU (v6e/v7x), f32 otherwise (v5e and older)."""
    try:
        kind = jax.devices()[0].device_kind.lower()
    except Exception:
        return jnp.float32
    for old in ("v2", "v3", "v4", "v5"):
        if old in kind:
            return jnp.float32
    return jnp.bfloat16


def mlp_kernel(x_ref,
               w1_ref, b1_ref,
               w2_ref, b2_ref,
               w3_ref, b3_ref,
               w4_ref, b4_ref,
               o_ref, *, act_dtype):
    # Raw f32 x tile -> bf16 in-kernel (no wrapper cast/pad pass over HBM).
    x = x_ref[...].astype(jnp.bfloat16)                       # (bm, in_size)

    def act(h_f32, b_ref):
        # bias-add + ReLU in act_dtype (bf16 on v6e/v7x, f32 on v5e); bf16 for the next MXU op.
        h = h_f32.astype(act_dtype) + b_ref[...].astype(act_dtype)
        return jnp.maximum(h, 0.0).astype(jnp.bfloat16)

    h = act(jnp.dot(x, w1_ref[...], preferred_element_type=jnp.float32), b1_ref)
    h = act(jnp.dot(h, w2_ref[...], preferred_element_type=jnp.float32), b2_ref)
    h = act(jnp.dot(h, w3_ref[...], preferred_element_type=jnp.float32), b3_ref)

    out = jnp.dot(h, w4_ref[...], preferred_element_type=jnp.float32) + b4_ref[...]
    o_ref[...] = out.astype(o_ref.dtype)                      # lane-dense (bm, out_pad) store


def prepare_params(params):
    """One-time prep (hoisted out of the forward): bf16 weights, final layer padded
    to a lane-dense multiple-of-128 output width."""
    out_size = params["w4"].shape[1]
    out_pad = _round_up(out_size, 128)

    w1 = params["w1"].astype(jnp.bfloat16)          # (in_size, 256) -- unpadded
    w2 = params["w2"].astype(jnp.bfloat16)
    w3 = params["w3"].astype(jnp.bfloat16)
    w4 = params["w4"].astype(jnp.bfloat16)
    b1 = params["b1"].astype(jnp.float32)
    b2 = params["b2"].astype(jnp.float32)
    b3 = params["b3"].astype(jnp.float32)
    b4 = params["b4"].astype(jnp.float32)
    if out_pad != out_size:
        w4 = jnp.pad(w4, ((0, 0), (0, out_pad - out_size)))
        b4 = jnp.pad(b4, ((0, 0), (0, out_pad - out_size)))
    return dict(w1=w1, b1=b1, w2=w2, b2=b2, w3=w3, b3=b3, w4=w4, b4=b4,
                out_size=out_size)


def mlp_forward(x, prepped, *, max_block_b=1024, act_dtype=None,
                store_dtype=jnp.bfloat16, return_dtype=jnp.float32):
    """x: (B, in_size) f32.  prepped: output of prepare_params()."""
    B, in_size = x.shape
    out_size = prepped["out_size"]
    w1, b1 = prepped["w1"], prepped["b1"]
    w2, b2 = prepped["w2"], prepped["b2"]
    w3, b3 = prepped["w3"], prepped["b3"]
    w4, b4 = prepped["w4"], prepped["b4"]
    out_pad = w4.shape[1]
    if act_dtype is None:
        act_dtype = _default_act_dtype()

    # ---- batch tiling ----
    # Big MXU-friendly tiles; aim for >=2 grid steps (v7x has 2 TCs on the "parallel"
    # axis) while keeping blocks a multiple of 16 rows.  Blocks need not divide B:
    # Pallas masks the ragged tail on writeback (row-wise independent compute, so
    # garbage-padded input rows never contaminate valid rows).
    block_b = min(max_block_b, _round_up(pl.cdiv(max(B, 1), 2), 16))
    if block_b >= B:
        block_b = B          # single full-extent block (always layout-legal)
    grid = (pl.cdiv(B, block_b),)

    def resident(a):
        # Small parameter stays VMEM-resident: constant block index every grid step.
        return pl.BlockSpec(a.shape, lambda i: (0, 0))

    n1 = w1.shape[1]
    n2 = w3.shape[1]
    flops = 2 * B * (in_size * n1 + n1 * n1 + n1 * n2 + n2 * out_pad)
    param_bytes = sum(int(a.size) * np.dtype(a.dtype).itemsize
                      for a in (w1, b1, w2, b2, w3, b3, w4, b4))
    bytes_accessed = (B * in_size * np.dtype(x.dtype).itemsize
                      + B * out_pad * np.dtype(store_dtype).itemsize
                      + param_bytes)

    # Note: at the default tile sizes VMEM use is well under the 32 MiB scoped
    # default on all generations; set vmem_limit_bytes only if max_block_b >= 4096.
    out_padded = pl.pallas_call(
        functools.partial(mlp_kernel, act_dtype=act_dtype),
        out_shape=jax.ShapeDtypeStruct((B, out_pad), store_dtype),
        grid_spec=pltpu.PrefetchScalarGridSpec(
            num_scalar_prefetch=0,
            grid=grid,
            in_specs=[
                pl.BlockSpec((block_b, in_size), lambda i: (i, 0)),   # raw f32 x tile
                resident(w1), resident(b1),
                resident(w2), resident(b2),
                resident(w3), resident(b3),
                resident(w4), resident(b4),
            ],
            out_specs=pl.BlockSpec((block_b, out_pad), lambda i: (i, 0)),
        ),
        compiler_params=pltpu.CompilerParams(
            dimension_semantics=("parallel",),
        ),
        cost_estimate=pl.CostEstimate(flops=flops, transcendentals=0,
                                      bytes_accessed=bytes_accessed),
    )(x, w1, b1, w2, b2, w3, b3, w4, b4)

    out = out_padded[:, :out_size]
    if return_dtype is not None and out.dtype != return_dtype:
        out = out.astype(return_dtype)
    return out


def init_params(key, in_size, out_size, n_internal=256, n_output=128):
    """Deterministic synthetic init (PyTorch nn.Linear default).  Weights transposed: (fan_in, fan_out)."""
    ks = jax.random.split(key, 8)

    def linear(kw, kb, fan_in, fan_out):
        bound = 1.0 / jnp.sqrt(jnp.float32(fan_in))
        w = jax.random.uniform(kw, (fan_in, fan_out), jnp.float32, -bound, bound)
        b = jax.random.uniform(kb, (1, fan_out), jnp.float32, -bound, bound)
        return w, b

    w1, b1 = linear(ks[0], ks[1], in_size, n_internal)
    w2, b2 = linear(ks[2], ks[3], n_internal, n_internal)
    w3, b3 = linear(ks[4], ks[5], n_internal, n_output)
    w4, b4 = linear(ks[6], ks[7], n_output, out_size)
    return dict(w1=w1, b1=b1, w2=w2, b2=b2, w3=w3, b3=b3, w4=w4, b4=b4)


def mlp_reference_bf16(x, p):
    """Reference with the same core numerics as the kernel (bf16 MXU inputs, f32 accumulate)."""
    def dot(a, w):
        return jnp.dot(a.astype(jnp.bfloat16), w.astype(jnp.bfloat16),
                       preferred_element_type=jnp.float32)
    h = jnp.maximum(dot(x, p["w1"]) + p["b1"], 0.0)
    h = jnp.maximum(dot(h, p["w2"]) + p["b2"], 0.0)
    h = jnp.maximum(dot(h, p["w3"]) + p["b3"], 0.0)
    return dot(h, p["w4"]) + p["b4"]


def mlp_reference_f32(x, p):
    h = jnp.maximum(x @ p["w1"] + p["b1"], 0.0)
    h = jnp.maximum(h @ p["w2"] + p["b2"], 0.0)
    h = jnp.maximum(h @ p["w3"] + p["b3"], 0.0)
    return h @ p["w4"] + p["b4"]


if __name__ == "__main__":
    key = jax.random.PRNGKey(0)
    k_param, k_x, k_x2 = jax.random.split(key, 3)

    batch, in_size, out_size = 16, 16, 8
    params = init_params(k_param, in_size, out_size, n_internal=256, n_output=128)
    prepped = prepare_params(params)   # one-time param prep (hoisted out of the forward)

    x = jax.random.normal(k_x, (batch, in_size), jnp.float32)
    fwd = jax.jit(lambda xx: mlp_forward(xx, prepped))
    out = jax.block_until_ready(fwd(x))
    assert out.shape == (batch, out_size)
    assert out.dtype == jnp.float32

    # Tight check vs a reference with matching (bf16 matmul / f32 accumulate) numerics.
    ref_bf16 = mlp_reference_bf16(x, params)
    assert jnp.allclose(out, ref_bf16, atol=2.5e-2, rtol=2.5e-2), "mismatch vs bf16-numerics reference"
    # Loose sanity check vs the full-f32 reference.
    ref_f32 = mlp_reference_f32(x, params)
    assert jnp.allclose(out, ref_f32, atol=6e-2, rtol=6e-2), "mismatch vs f32 reference"

    # Exercise the multi-step grid + ragged last block path (still small shapes).
    x2 = jax.random.normal(k_x2, (200, in_size), jnp.float32)
    out2 = jax.block_until_ready(mlp_forward(x2, prepped))
    assert out2.shape == (200, out_size)
    ref2 = mlp_reference_bf16(x2, params)
    assert jnp.allclose(out2, ref2, atol=2.5e-2, rtol=2.5e-2), "mismatch on multi-step/ragged batch"

    print("KERNEL_OK")
</pallas_src>

<mosaic_0001>
module attributes {stable_mosaic.version = 11 : i64} {
  func.func @mlp_kernel(%arg0: i32, %arg1: memref<16x16xf32, #tpu.memory_space<vmem>>, %arg2: memref<16x256xbf16, #tpu.memory_space<vmem>>, %arg3: memref<1x256xf32, #tpu.memory_space<vmem>>, %arg4: memref<256x256xbf16, #tpu.memory_space<vmem>>, %arg5: memref<1x256xf32, #tpu.memory_space<vmem>>, %arg6: memref<256x128xbf16, #tpu.memory_space<vmem>>, %arg7: memref<1x128xf32, #tpu.memory_space<vmem>>, %arg8: memref<128x128xbf16, #tpu.memory_space<vmem>>, %arg9: memref<1x128xf32, #tpu.memory_space<vmem>>, %arg10: memref<16x128xbf16, #tpu.memory_space<vmem>>) attributes {dimension_semantics = [#tpu.dimension_semantics<parallel>], iteration_bounds = array<i64: 1>, scalar_prefetch = 0 : i64, scratch_operands = 0 : i64, tpu.core_type = #tpu.core_type<tc>, window_params = [{transform_indices = @transform_0, window_bounds = array<i64: 16, 16>}, {pipeline_mode = #tpu.pipeline_mode<synchronous>, transform_indices = @transform_1, window_bounds = array<i64: 16, 256>}, {pipeline_mode = #tpu.pipeline_mode<synchronous>, transform_indices = @transform_2, window_bounds = array<i64: 1, 256>}, {pipeline_mode = #tpu.pipeline_mode<synchronous>, transform_indices = @transform_3, window_bounds = array<i64: 256, 256>}, {pipeline_mode = #tpu.pipeline_mode<synchronous>, transform_indices = @transform_4, window_bounds = array<i64: 1, 256>}, {pipeline_mode = #tpu.pipeline_mode<synchronous>, transform_indices = @transform_5, window_bounds = array<i64: 256, 128>}, {pipeline_mode = #tpu.pipeline_mode<synchronous>, transform_indices = @transform_6, window_bounds = array<i64: 1, 128>}, {pipeline_mode = #tpu.pipeline_mode<synchronous>, transform_indices = @transform_7, window_bounds = array<i64: 128, 128>}, {pipeline_mode = #tpu.pipeline_mode<synchronous>, transform_indices = @transform_8, window_bounds = array<i64: 1, 128>}, {transform_indices = @transform_9, window_bounds = array<i64: 16, 128>}]} {
    %c0 = arith.constant 0 : index
    %c0_0 = arith.constant 0 : index
    %0 = vector.load %arg1[%c0, %c0_0] : memref<16x16xf32, #tpu.memory_space<vmem>>, vector<16x16xf32>
    %1 = arith.truncf %0 : vector<16x16xf32> to vector<16x16xbf16>
    %c0_1 = arith.constant 0 : index
    %c0_2 = arith.constant 0 : index
    %2 = vector.load %arg2[%c0_1, %c0_2] : memref<16x256xbf16, #tpu.memory_space<vmem>>, vector<16x256xbf16>
    %cst = arith.constant dense<0.000000e+00> : vector<16x256xf32>
    %3 = tpu.matmul %1, %2, %cst {dimension_numbers = #tpu.dot_dimension_numbers<[1], [0], [0], [1], [0, 0, 1, 1], [], []>} : vector<16x16xbf16>, vector<16x256xbf16>, vector<16x256xf32> -> vector<16x256xf32>
    %4 = arith.truncf %3 : vector<16x256xf32> to vector<16x256xbf16>
    %c0_3 = arith.constant 0 : index
    %c0_4 = arith.constant 0 : index
    %5 = vector.load %arg3[%c0_3, %c0_4] : memref<1x256xf32, #tpu.memory_space<vmem>>, vector<1x256xf32>
    %6 = arith.truncf %5 : vector<1x256xf32> to vector<1x256xbf16>
    %7 = vector.broadcast %6 : vector<1x256xbf16> to vector<16x256xbf16>
    %8 = arith.addf %4, %7 : vector<16x256xbf16>
    %cst_5 = arith.constant 0.000000e+00 : bf16
    %9 = vector.broadcast %cst_5 : bf16 to vector<16x256xbf16>
    %10 = arith.maximumf %8, %9 : vector<16x256xbf16>
    %c0_6 = arith.constant 0 : index
    %c0_7 = arith.constant 0 : index
    %11 = vector.load %arg4[%c0_6, %c0_7] : memref<256x256xbf16, #tpu.memory_space<vmem>>, vector<256x256xbf16>
    %cst_8 = arith.constant dense<0.000000e+00> : vector<16x256xf32>
    %12 = tpu.matmul %10, %11, %cst_8 {dimension_numbers = #tpu.dot_dimension_numbers<[1], [0], [0], [1], [0, 0, 1, 1], [], []>} : vector<16x256xbf16>, vector<256x256xbf16>, vector<16x256xf32> -> vector<16x256xf32>
    %13 = arith.truncf %12 : vector<16x256xf32> to vector<16x256xbf16>
    %c0_9 = arith.constant 0 : index
    %c0_10 = arith.constant 0 : index
    %14 = vector.load %arg5[%c0_9, %c0_10] : memref<1x256xf32, #tpu.memory_space<vmem>>, vector<1x256xf32>
    %15 = arith.truncf %14 : vector<1x256xf32> to vector<1x256xbf16>
    %16 = vector.broadcast %15 : vector<1x256xbf16> to vector<16x256xbf16>
    %17 = arith.addf %13, %16 : vector<16x256xbf16>
    %cst_11 = arith.constant 0.000000e+00 : bf16
    %18 = vector.broadcast %cst_11 : bf16 to vector<16x256xbf16>
    %19 = arith.maximumf %17, %18 : vector<16x256xbf16>
    %c0_12 = arith.constant 0 : index
    %c0_13 = arith.constant 0 : index
    %20 = vector.load %arg6[%c0_12, %c0_13] : memref<256x128xbf16, #tpu.memory_space<vmem>>, vector<256x128xbf16>
    %cst_14 = arith.constant dense<0.000000e+00> : vector<16x128xf32>
    %21 = tpu.matmul %19, %20, %cst_14 {dimension_numbers = #tpu.dot_dimension_numbers<[1], [0], [0], [1], [0, 0, 1, 1], [], []>} : vector<16x256xbf16>, vector<256x128xbf16>, vector<16x128xf32> -> vector<16x128xf32>
    %22 = arith.truncf %21 : vector<16x128xf32> to vector<16x128xbf16>
    %c0_15 = arith.constant 0 : index
    %c0_16 = arith.constant 0 : index
    %23 = vector.load %arg7[%c0_15, %c0_16] : memref<1x128xf32, #tpu.memory_space<vmem>>, vector<1x128xf32>
    %24 = arith.truncf %23 : vector<1x128xf32> to vector<1x128xbf16>
    %25 = vector.broadcast %24 : vector<1x128xbf16> to vector<16x128xbf16>
    %26 = arith.addf %22, %25 : vector<16x128xbf16>
    %cst_17 = arith.constant 0.000000e+00 : bf16
    %27 = vector.broadcast %cst_17 : bf16 to vector<16x128xbf16>
    %28 = arith.maximumf %26, %27 : vector<16x128xbf16>
    %c0_18 = arith.constant 0 : index
    %c0_19 = arith.constant 0 : index
    %29 = vector.load %arg8[%c0_18, %c0_19] : memref<128x128xbf16, #tpu.memory_space<vmem>>, vector<128x128xbf16>
    %cst_20 = arith.constant dense<0.000000e+00> : vector<16x128xf32>
    %30 = tpu.matmul %28, %29, %cst_20 {dimension_numbers = #tpu.dot_dimension_numbers<[1], [0], [0], [1], [0, 0, 1, 1], [], []>} : vector<16x128xbf16>, vector<128x128xbf16>, vector<16x128xf32> -> vector<16x128xf32>
    %c0_21 = arith.constant 0 : index
    %c0_22 = arith.constant 0 : index
    %31 = vector.load %arg9[%c0_21, %c0_22] : memref<1x128xf32, #tpu.memory_space<vmem>>, vector<1x128xf32>
    %32 = vector.broadcast %31 : vector<1x128xf32> to vector<16x128xf32>
    %33 = arith.addf %30, %32 : vector<16x128xf32>
    %34 = arith.truncf %33 : vector<16x128xf32> to vector<16x128xbf16>
    %c0_23 = arith.constant 0 : index
    %c0_24 = arith.constant 0 : index
    %35 = vector.load %arg10[%c0_23, %c0_24] : memref<16x128xbf16, #tpu.memory_space<vmem>>, vector<16x128xbf16>
    tpu.vector_store %arg10[%c0_23, %c0_24], %34 {strides = array<i32>} : memref<16x128xbf16, #tpu.memory_space<vmem>>, vector<16x128xbf16>,
    return
  }
  func.func @transform_0(%arg0: i32) -> (i32, i32) {
    %c0_i32 = arith.constant 0 : i32
    %c0_i32_0 = arith.constant 0 : i32
    return %arg0, %c0_i32 : i32, i32
  }
  func.func @transform_1(%arg0: i32) -> (i32, i32) {
    %c0_i32 = arith.constant 0 : i32
    %c0_i32_0 = arith.constant 0 : i32
    %c0_i32_1 = arith.constant 0 : i32
    return %c0_i32, %c0_i32_0 : i32, i32
  }
  func.func @transform_2(%arg0: i32) -> (i32, i32) {
    %c0_i32 = arith.constant 0 : i32
    %c0_i32_0 = arith.constant 0 : i32
    %c0_i32_1 = arith.constant 0 : i32
    return %c0_i32, %c0_i32_0 : i32, i32
  }
  func.func @transform_3(%arg0: i32) -> (i32, i32) {
    %c0_i32 = arith.constant 0 : i32
    %c0_i32_0 = arith.constant 0 : i32
    %c0_i32_1 = arith.constant 0 : i32
    return %c0_i32, %c0_i32_0 : i32, i32
  }
  func.func @transform_4(%arg0: i32) -> (i32, i32) {
    %c0_i32 = arith.constant 0 : i32
    %c0_i32_0 = arith.constant 0 : i32
    %c0_i32_1 = arith.constant 0 : i32
    return %c0_i32, %c0_i32_0 : i32, i32
  }
  func.func @transform_5(%arg0: i32) -> (i32, i32) {
    %c0_i32 = arith.constant 0 : i32
    %c0_i32_0 = arith.constant 0 : i32
    %c0_i32_1 = arith.constant 0 : i32
    return %c0_i32, %c0_i32_0 : i32, i32
  }
  func.func @transform_6(%arg0: i32) -> (i32, i32) {
    %c0_i32 = arith.constant 0 : i32
    %c0_i32_0 = arith.constant 0 : i32
    %c0_i32_1 = arith.constant 0 : i32
    return %c0_i32, %c0_i32_0 : i32, i32
  }
  func.func @transform_7(%arg0: i32) -> (i32, i32) {
    %c0_i32 = arith.constant 0 : i32
    %c0_i32_0 = arith.constant 0 : i32
    %c0_i32_1 = arith.constant 0 : i32
    return %c0_i32, %c0_i32_0 : i32, i32
  }
  func.func @transform_8(%arg0: i32) -> (i32, i32) {
    %c0_i32 = arith.constant 0 : i32
    %c0_i32_0 = arith.constant 0 : i32
    %c0_i32_1 = arith.constant 0 : i32
    return %c0_i32, %c0_i32_0 : i32, i32
  }
  func.func @transform_9(%arg0: i32) -> (i32, i32) {
    %c0_i32 = arith.constant 0 : i32
    %c0_i32_0 = arith.constant 0 : i32
    return %arg0, %c0_i32 : i32, i32
  }
}

</mosaic_0001>

<bundles_post_ra>
// kernel: _lambda_.1
= control target key start
LH: loop header
LB: loop body
LE: loop exit
PB: predicated region body
PF: predicated region fallthrough
CT: control target
= control target key end

     0   :  { %v903_v1 = vmov 0   ;;  %vm48_vm0 = vcmask 130048   ;;  %v99_v49 = vlaneseq  ;;  %vm905_vm1 = vmmov 0   ;;  %s1166_s1 = inlined_call_operand.vmem [shape: bf16[16,256], index: 1, kind: input, shape index: {}]   ;;  %s1167_s0 = inlined_call_operand.vmem [shape: f32[16,16], index: 0, kind: input, shape index: {}]   ;;  %s1168_s3 = inlined_call_operand.vmem [shape: bf16[256,256], index: 3, kind: input, shape index: {}]   ;;  %s1169_s5 = inlined_call_operand.vmem [shape: bf16[256,128], index: 5, kind: input, shape index: {}]   ;;  %s1170_s2 = inlined_call_operand.vmem [shape: f32[1,256], index: 2, kind: input, shape index: {}]   ;;  %s1171_s7 = inlined_call_operand.vmem [shape: bf16[128,128], index: 7, kind: input, shape index: {}]   ;;  %s1172_s4 = inlined_call_operand.vmem [shape: f32[1,256], index: 4, kind: input, shape index: {}]   ;;  %s1173_s6 = inlined_call_operand.vmem [shape: f32[1,128], index: 6, kind: input, shape index: {}]   ;;  %s1174_s8 = inlined_call_operand.vmem [shape: f32[1,128], index: 8, kind: input, shape index: {}]   ;;  %s1175_s9 = inlined_call_operand.vmem [shape: bf16[16,128], index: 9, kind: output, shape index: {}]  }
   0x1   :  { %v828_v0 = vld [vmem:[%s1166_s1 + $0x4] ss:$8 sps:$4 sm:$0xff]   ;;  %84 = vmatprep.mubr.bf16.mxu0 %v903_v1  ;;  %v830_v2 = vld [vmem:[%s1166_s1] ss:$8 sps:$4 sm:$0xff]   ;;  %v834_v8 = vld [vmem:[%s1168_s3 + $0x14] ss:$8 sps:$4 sm:$0xff]  }
   0x2   :  { %v33_v3 = vld [vmem:[%s1167_s0] sm:$0xff]  ;;  %v34_v4 = vld [vmem:[%s1167_s0 + $0x8] sm:$0xff]  ;;  %52 = vmatprep.subr.bf16.mxu0 %v828_v0  ;;  %v836_v9 = vld [vmem:[%s1168_s3 + $0x10] ss:$8 sps:$4 sm:$0xff]   ;;  %v100_v50 = vshrl.u32 %v99_v49, 7 }
   0x3   :  { %v35_v5 = vpack.c.bf16 %v34_v4, %v33_v3  ;;  %v831_v6 = vld [vmem:[%s1168_s3 + $0x4] ss:$8 sps:$4 sm:$0xff]   ;;  %53 = vmatpush1.bf16.msra.mxu0 %v830_v2  ;;  %v833_v7 = vld [vmem:[%s1168_s3] ss:$8 sps:$4 sm:$0xff]   ;;  %v840_v12 = vld [vmem:[%s1168_s3 + $0x34] ss:$8 sps:$4 sm:$0xff]  }
   0x4   :  { %321 = vmatprep.subr.bf16.mxu1 %v831_v6  ;;  %v837_v10 = vld [vmem:[%s1168_s3 + $0x24] ss:$8 sps:$4 sm:$0xff]   ;;  %v839_v11 = vld [vmem:[%s1168_s3 + $0x20] ss:$8 sps:$4 sm:$0xff]   ;;  %v842_v13 = vld [vmem:[%s1168_s3 + $0x30] ss:$8 sps:$4 sm:$0xff]  }
   0x5   :  { %322 = vmatpush1.bf16.msra.mxu1 %v833_v7  ;;  %v843_v14 = vld [vmem:[%s1168_s3 + $0x44] ss:$8 sps:$4 sm:$0xff]   ;;  %v845_v15 = vld [vmem:[%s1168_s3 + $0x40] ss:$8 sps:$4 sm:$0xff]   ;;  %v846_v16 = vld [vmem:[%s1168_s3 + $0x54] ss:$8 sps:$4 sm:$0xff]  }
   0x6   :  { %707 = vmatmul.mubr.msk.bf16.vlgmr.msra.gmra.mrb[0].mxu0 %vm48_vm0, %v35_v5  ;;  %323 = vmatprep.subr.bf16.mxu1 %v834_v8  ;;  %v848_v17 = vld [vmem:[%s1168_s3 + $0x50] ss:$8 sps:$4 sm:$0xff]   ;;  %v849_v18 = vld [vmem:[%s1168_s3 + $0x64] ss:$8 sps:$4 sm:$0xff]   ;;  %v851_v19 = vld [vmem:[%s1168_s3 + $0x60] ss:$8 sps:$4 sm:$0xff]  }
   0x7   :  { %v852_v20 = vld [vmem:[%s1168_s3 + $0x74] ss:$8 sps:$4 sm:$0xff]   ;;  %v854_v21 = vld [vmem:[%s1168_s3 + $0x70] ss:$8 sps:$4 sm:$0xff]   ;;  %v855_v22 = vld [vmem:[%s1168_s3 + $0x84] ss:$8 sps:$4 sm:$0xff]  }
   0x8   :  { %v857_v23 = vld [vmem:[%s1168_s3 + $0x80] ss:$8 sps:$4 sm:$0xff]   ;;  %v858_v24 = vld [vmem:[%s1168_s3 + $0x94] ss:$8 sps:$4 sm:$0xff]   ;;  %v860_v25 = vld [vmem:[%s1168_s3 + $0x90] ss:$8 sps:$4 sm:$0xff]  }
   0x9   :  { %324 = vmatpush1.bf16.msra.mxu1 %v836_v9  ;;  %v861_v26 = vld [vmem:[%s1168_s3 + $0xa4] ss:$8 sps:$4 sm:$0xff]   ;;  %v863_v27 = vld [vmem:[%s1168_s3 + $0xa0] ss:$8 sps:$4 sm:$0xff]   ;;  %v864_v28 = vld [vmem:[%s1168_s3 + $0xb4] ss:$8 sps:$4 sm:$0xff]  }
   0xa   :  { %325 = vmatprep.subr.bf16.mxu1 %v837_v10  ;;  %v866_v29 = vld [vmem:[%s1168_s3 + $0xb0] ss:$8 sps:$4 sm:$0xff]   ;;  %v867_v30 = vld [vmem:[%s1168_s3 + $0xc4] ss:$8 sps:$4 sm:$0xff]   ;;  %v869_v31 = vld [vmem:[%s1168_s3 + $0xc0] ss:$8 sps:$4 sm:$0xff]  }
   0xb   :  { %v870_v32 = vld [vmem:[%s1168_s3 + $0xd4] ss:$8 sps:$4 sm:$0xff]   ;;  %v872_v33 = vld [vmem:[%s1168_s3 + $0xd0] ss:$8 sps:$4 sm:$0xff]   ;;  %v873_v34 = vld [vmem:[%s1168_s3 + $0xe4] ss:$8 sps:$4 sm:$0xff]  }
   0xc   :  { %v875_v35 = vld [vmem:[%s1168_s3 + $0xe0] ss:$8 sps:$4 sm:$0xff]   ;;  %v876_v36 = vld [vmem:[%s1168_s3 + $0xf4] ss:$8 sps:$4 sm:$0xff]   ;;  %v878_v37 = vld [vmem:[%s1168_s3 + $0xf0] ss:$8 sps:$4 sm:$0xff]  }
   0xd   :  { %326 = vmatpush1.bf16.msra.mxu1 %v839_v11  ;;  %v879_v38 = vld [vmem:[%s1169_s5 + $0x40] sm:$0xff]   ;;  %v881_v40 = vld [vmem:[%s1169_s5 + $0x48] sm:$0xff]   ;;  %v883_v42 = vld [vmem:[%s1169_s5 + $0x50] sm:$0xff]   ;;  %v1098_v51 = vsub.s32 0, %v100_v50  ;;  %v105_v53 = vsub.s32 1, %v100_v50 }
   0xe   :  { %327 = vmatprep.subr.bf16.mxu1 %v840_v12  ;;  %v880_v39 = vld [vmem:[%s1169_s5] sm:$0xff]   ;;  %774 = vmatprep.subr.bf16.mxu0 %v879_v38  ;;  %v882_v41 = vld [vmem:[%s1169_s5 + $0x8] sm:$0xff]   ;;  %v884_v43 = vld [vmem:[%s1169_s5 + $0x10] sm:$0xff]  }
   0xf   :  { %775 = vmatpush3.bf16.msra.mxu0 %v880_v39  ;;  %v885_v44 = vld [vmem:[%s1169_s5 + $0x58] sm:$0xff]   ;;  %v887_v46 = vld [vmem:[%s1169_s5 + $0x60] sm:$0xff]   ;;  %v889_v48 = vld [vmem:[%s1169_s5 + $0x68] sm:$0xff]  }
  0x10   :  { %776 = vmatprep.subr.bf16.mxu0 %v881_v40  ;;  %v886_v45 = vld [vmem:[%s1169_s5 + $0x18] sm:$0xff]   ;;  %v888_v47 = vld [vmem:[%s1169_s5 + $0x20] sm:$0xff]   ;;  %v890_v9 = vld [vmem:[%s1169_s5 + $0x28] sm:$0xff]  }
  0x11   :  { %328 = vmatpush1.bf16.msra.mxu1 %v842_v13  ;;  %v97_v52 = vld [vmem:[%s1170_s2] sm:$0x3]  ;;  %v891_v10 = vld [vmem:[%s1169_s5 + $0x70] sm:$0xff]   ;;  %v893_v12 = vld [vmem:[%s1169_s5 + $0x78] sm:$0xff]  }
  0x12   :  { %329 = vmatprep.subr.bf16.mxu1 %v843_v14  ;;  %v102_v54 = vrot.slane %v97_v52, %v1098_v51  ;;  %v106_v55 = vrot.slane %v97_v52, %v105_v53  ;;  %v892_v11 = vld [vmem:[%s1169_s5 + $0x30] sm:$0xff]   ;;  %v894_v13 = vld [vmem:[%s1169_s5 + $0x38] sm:$0xff]   ;;  %v904_v14 = vmov 0.0   ;;  %v899_v38 = vld [vmem:[%s1171_s7 + $0x20] sm:$0xff]  }
  0x13   :  { %777 = vmatpush3.bf16.msra.mxu0 %v882_v41  ;;  %v900_v39 = vld [vmem:[%s1171_s7 + $0x28] sm:$0xff]   ;;  %v901_v40 = vld [vmem:[%s1171_s7 + $0x30] sm:$0xff]   ;;  %v902_v41 = vld [vmem:[%s1171_s7 + $0x38] sm:$0xff]  }
  0x14   :  { %778 = vmatprep.subr.bf16.mxu0 %v883_v42  ;;  %v109_v56 = vpack.c.bf16 %v102_v54, %v102_v54  ;;  %v110_v57 = vpack.c.bf16 %v106_v55, %v106_v55  ;;  %v568_v42 = vld [vmem:[%s1173_s6] sm:$0x1] }
  0x15   :  { %330 = vmatpush1.bf16.msra.mxu1 %v845_v15  ;;  %v366_v15 = vld [vmem:[%s1172_s4] sm:$0x3] }
  0x16   :  { %331 = vmatprep.subr.bf16.mxu1 %v846_v16  ;;  %v112_v58 = vpack.i.b16 %v109_v56, %v109_v56  ;;  %v119_v59 = vpack.i.b16 %v110_v57, %v110_v57  ;;  %v371_v16 = vrot.slane %v366_v15, %v1098_v51  ;;  %v756_v56 = vld [vmem:[%s1174_s8] ss:$0 sm:$0xff] }
  0x17   :  { %779 = vmatpush3.bf16.msra.mxu0 %v884_v43  ;;  %v569_v43 = vpack.c.bf16 %v568_v42, %v568_v42 }
  0x18   :  { %780 = vmatprep.subr.bf16.mxu0 %v885_v44  ;;  %v117_v62 = vrot.slane %v112_v58, %v1098_v51  ;;  %v124_v0 = vrot.slane %v119_v59, %v1098_v51 }
  0x19   :  { %332 = vmatpush1.bf16.msra.mxu1 %v848_v17  ;;  %v375_v17 = vrot.slane %v366_v15, %v105_v53 }
  0x1a   :  { %333 = vmatprep.subr.bf16.mxu1 %v849_v18  ;;  %v378_v18 = vpack.c.bf16 %v371_v16, %v371_v16 }
  0x1b   :  { %781 = vmatpush3.bf16.msra.mxu0 %v886_v45  ;;  %v571_v45 = vpack.i.b16 %v569_v43, %v569_v43 }
  0x1c   :  { %782 = vmatprep.subr.bf16.mxu0 %v887_v46 }
  0x1d   :  { %334 = vmatpush1.bf16.msra.mxu1 %v851_v19  ;;  %v379_v19 = vpack.c.bf16 %v375_v17, %v375_v17  ;;  %v576_v52 = vrot.slane %v571_v45, %v1098_v51 }
  0x1e   :  { %335 = vmatprep.subr.bf16.mxu1 %v852_v20  ;;  %v381_v20 = vpack.i.b16 %v378_v18, %v378_v18 }
  0x1f   :  { %783 = vmatpush3.bf16.msra.mxu0 %v888_v47 }
  0x20   :  { %784 = vmatprep.subr.bf16.mxu0 %v889_v48 }
  0x21   :  { %336 = vmatpush1.bf16.msra.mxu1 %v854_v21  ;;  %v388_v21 = vpack.i.b16 %v379_v19, %v379_v19 }
  0x22   :  { %337 = vmatprep.subr.bf16.mxu1 %v855_v22 }
  0x23   :  { %785 = vmatpush3.bf16.msra.mxu0 %v890_v9 }
  0x24   :  { %786 = vmatprep.subr.bf16.mxu0 %v891_v10 }
  0x25   :  { %338 = vmatpush1.bf16.msra.mxu1 %v857_v23 }
  0x26   :  { %339 = vmatprep.subr.bf16.mxu1 %v858_v24  ;;  %v386_v24 = vrot.slane %v381_v20, %v1098_v51 }
  0x27   :  { %787 = vmatpush3.bf16.msra.mxu0 %v892_v11 }
  0x28   :  { %788 = vmatprep.subr.bf16.mxu0 %v893_v12 }
  0x29   :  { %340 = vmatpush1.bf16.msra.mxu1 %v860_v25 }
  0x2a   :  { %341 = vmatprep.subr.bf16.mxu1 %v861_v26  ;;  %v393_v26 = vrot.slane %v388_v21, %v1098_v51 }
  0x2b   :  { %789 = vmatpush3.bf16.msra.mxu0 %v894_v13 }
  0x2c   :  { %805 = vmatprep.subr.bf16.mxu0 %v904_v14 }
  0x2d   :  { %342 = vmatpush1.bf16.msra.mxu1 %v863_v27 }
  0x2e   :  { %343 = vmatprep.subr.bf16.mxu1 %v864_v28 }
  0x31   :  { %344 = vmatpush1.bf16.msra.mxu1 %v866_v29 }
  0x32   :  { %345 = vmatprep.subr.bf16.mxu1 %v867_v30 }
  0x35   :  { %346 = vmatpush1.bf16.msra.mxu1 %v869_v31 }
  0x36   :  { %347 = vmatprep.subr.bf16.mxu1 %v870_v32 }
  0x39   :  { %348 = vmatpush1.bf16.msra.mxu1 %v872_v33  ;;  %v895_v33 = vld [vmem:[%s1171_s7] sm:$0xff]  }
  0x3a   :  { %349 = vmatprep.subr.bf16.mxu1 %v873_v34 }
  0x3d   :  { %350 = vmatpush1.bf16.msra.mxu1 %v875_v35  ;;  %v896_v35 = vld [vmem:[%s1171_s7 + $0x8] sm:$0xff]  }
  0x3e   :  { %351 = vmatprep.subr.bf16.mxu1 %v876_v36  ;;  %v897_v36 = vld [vmem:[%s1171_s7 + $0x10] sm:$0xff]  }
  0x41   :  { %352 = vmatpush1.bf16.msra.mxu1 %v878_v37  ;;  %v898_v37 = vld [vmem:[%s1171_s7 + $0x18] sm:$0xff]  }
  0xd9   :  { %v86_v60 = vpop.f32.mrb[0].mxu0 }
  0xda   :  { %v88_v61 = vpop.f32.mrb[1].mxu0 }
  0xdb   :  { %v90_v63 = vpop.f32.mrb[2].mxu0 }
  0xdc   :  { %v95_v2 = vpack.c.bf16 %v90_v63, %v86_v60  ;;  %v92_v3 = vpop.f32.mrb[3].mxu0 }
  0xdd   :  { %v96_v4 = vpack.c.bf16 %v92_v3, %v88_v61 }
  0xde   :  { %v125_v5 = vadd.bf16 %v117_v62, %v95_v2 }
  0xdf   :  { %v126_v6 = vadd.bf16 %v124_v0, %v96_v4 }
  0xe0   :  { %v127_v8 = vmax.bf16 %v903_v1, %v125_v5 }
  0xe1   :  { %v128_v7 = vmax.bf16 %v903_v1, %v126_v6 }
  0xe3   :  { %353 = vmatprep.mubr.bf16.mxu1 %v128_v7 }
  0xe4   :  { %354 = vmatmul.mubr.bf16.vlgmr.msra.gmra.mrb[0].mxu1 %v127_v8 }
 0x1b7   :  { %v355_v22 = vpop.f32.mrb[0].mxu1 }
 0x1b8   :  { %v357_v23 = vpop.f32.mrb[1].mxu1 }
 0x1b9   :  { %v359_v25 = vpop.f32.mrb[2].mxu1 }
 0x1ba   :  { %v364_v27 = vpack.c.bf16 %v359_v25, %v355_v22  ;;  %v361_v28 = vpop.f32.mrb[3].mxu1 }
 0x1bb   :  { %v365_v29 = vpack.c.bf16 %v361_v28, %v357_v23 }
 0x1bc   :  { %v394_v30 = vadd.bf16 %v386_v24, %v364_v27 }
 0x1bd   :  { %v395_v31 = vadd.bf16 %v393_v26, %v365_v29 }
 0x1be   :  { %v396_v34 = vmax.bf16 %v903_v1, %v394_v30 }
 0x1bf   :  { %v397_v32 = vmax.bf16 %v903_v1, %v395_v31 }
 0x1c1   :  { %558 = vmatprep.mubr.bf16.mxu0 %v397_v32 }
 0x1c2   :  { %559 = vmatmul.mubr.bf16.vlgmr.msra.gmra.mrb[4].mxu0 %v396_v34 }
 0x1c3   :  { %806 = vmatpush3.bf16.msra.mxu0 %v895_v33  ;;  %821 = vmatprep.mubr.msk.bf16.mxu0 %vm905_vm1, %v904_v14 }
 0x1c4   :  { %807 = vmatprep.subr.bf16.mxu0 %v904_v14 }
 0x1c7   :  { %808 = vmatpush3.bf16.msra.mxu0 %v896_v35 }
 0x1c8   :  { %809 = vmatprep.subr.bf16.mxu0 %v904_v14 }
 0x1cb   :  { %810 = vmatpush3.bf16.msra.mxu0 %v897_v36 }
 0x1cc   :  { %811 = vmatprep.subr.bf16.mxu0 %v904_v14 }
 0x1cf   :  { %812 = vmatpush3.bf16.msra.mxu0 %v898_v37 }
 0x1d0   :  { %813 = vmatprep.subr.bf16.mxu0 %v904_v14 }
 0x1d3   :  { %814 = vmatpush3.bf16.msra.mxu0 %v899_v38 }
 0x1d4   :  { %815 = vmatprep.subr.bf16.mxu0 %v904_v14 }
 0x1d7   :  { %816 = vmatpush3.bf16.msra.mxu0 %v900_v39 }
 0x1d8   :  { %817 = vmatprep.subr.bf16.mxu0 %v904_v14 }
 0x1db   :  { %818 = vmatpush3.bf16.msra.mxu0 %v901_v40 }
 0x1dc   :  { %819 = vmatprep.subr.bf16.mxu0 %v904_v14 }
 0x1df   :  { %820 = vmatpush3.bf16.msra.mxu0 %v902_v41 }
 0x295   :  { %v790_v44 = vpop.f32.mrb[4].mxu0 }
 0x296   :  { %v791_v46 = vpop.f32.mrb[5].mxu0 }
 0x297   :  { %v792_v47 = vadd.f32 %v791_v46, %v790_v44  ;;  %v793_v48 = vpop.f32.mrb[6].mxu0 }
 0x298   :  { %v794_v49 = vpop.f32.mrb[7].mxu0 }
 0x299   :  { %v795_v50 = vadd.f32 %v794_v49, %v793_v48 }
 0x29b   :  { %v567_v53 = vpack.c.bf16 %v795_v50, %v792_v47 }
 0x29d   :  { %v577_v54 = vadd.bf16 %v576_v52, %v567_v53 }
 0x29f   :  { %v578_v55 = vmax.bf16 %v903_v1, %v577_v54 }
 0x2a1   :  { %822 = vmatmul.mubr.bf16.vlgmr.msra.gmra.mrb[8].mxu0 %v578_v55 }
 0x374   :  { %v684_v57 = vpop.f32.mrb[8].mxu0 }
 0x375   :  { %v823_v58 = vpop.f32.mrb[9].mxu0  ;;  %v685_v60 = vadd.f32 %v756_v56, %v684_v57 }
 0x376   :  { %v687_v59 = vpop.f32.mrb[10].mxu0 }
 0x377   :  { %v688_v61 = vadd.f32 %v756_v56, %v687_v59  ;;  %v824_v62 = vpop.f32.mrb[11].mxu0 }
 0x379   :  { %v772_v63 = vpack.c.bf16 %v688_v61, %v685_v60 }
 0x37b   :  { %773 = vst [vmem:[%s1175_s9] sm:$0xff] %v772_v63  }

</bundles_post_ra>
